<compile_context>
chip_gen: v6e
topology: v6e:2x2x1
jax: 0.10.0
libtpu: 0.0.40
codegen_flags: <defaults>
</compile_context>

<pallas_src>
import math

import jax
import jax.numpy as jnp
from jax.experimental import pallas as pl
from jax.experimental.pallas import tpu as pltpu


# ----------------------------------------------------------------------------
# helpers
# ----------------------------------------------------------------------------
_GELU_C = math.sqrt(2.0 / math.pi)


def _gelu_tanh(x):
    # tanh-approx GELU (VPU + EUP; stays in the matmul's shadow).
    return 0.5 * x * (1.0 + jnp.tanh(_GELU_C * (x + 0.044715 * x * x * x)))


def _round_up(x, m):
    return ((x + m - 1) // m) * m


def _pad2(a, target_shape):
    pads = [(0, t - s) for s, t in zip(a.shape, target_shape)]
    if all(p == (0, 0) for p in pads):
        return a
    return jnp.pad(a, pads)


def _tpu_config():
    """Generation-aware (lane_align, vmem_limit_bytes, dual_tensorcore)."""
    kind = ""
    try:
        kind = jax.devices()[0].device_kind.lower()
    except Exception:
        pass
    # v7x: 64 MiB VMEM/TC, 2 TCs; v5e/v6e: 128 MiB, 1 TC.
    vmem_cap = 64 * 2**20 if "v7" in kind else 128 * 2**20
    try:
        info = pltpu.get_tpu_info()
        vmem_cap = int(getattr(info, "vmem_capacity_bytes", vmem_cap))
    except Exception:
        pass
    # v6e/v7x MXUs are 2x256x256 -> 256 lane alignment; v5e (4x128x128) -> 128.
    lane_align = 256 if any(t in kind for t in ("v6", "v7", "trillium")) else 128
    dual_tc = "v7" in kind
    vmem_limit = min(100 * 2**20, max(32 * 2**20, vmem_cap - 12 * 2**20))
    return lane_align, vmem_limit, dual_tc


# ----------------------------------------------------------------------------
# kernel factory: one (row tile, H tile) step of the feed-forward
# ----------------------------------------------------------------------------
def _make_ffn_kernel(gelu_dtype, mxu_dtype):
    def kernel(x_ref, w1_ref, b1_ref, w2_ref, b2_ref, o_ref, acc_ref):
        # x_ref:  (TM, D_pad)      w1_ref: (D_pad, TH)   b1_ref: (1, TH) f32
        # w2_ref: (TH, D_pad)      b2_ref: (1, D_pad) f32
        # o_ref:  (TM, D_pad)      acc_ref: (TM, D_pad) f32 scratch
        k = pl.program_id(1)

        @pl.when(k == 0)
        def _init():
            acc_ref[...] = jnp.zeros_like(acc_ref)

        h = jnp.dot(x_ref[...], w1_ref[...], preferred_element_type=jnp.float32)
        h = h + b1_ref[...]                        # f32 bias-add
        h = _gelu_tanh(h.astype(gelu_dtype))       # bf16 GELU only where safe
        acc_ref[...] += jnp.dot(h.astype(mxu_dtype), w2_ref[...],
                                preferred_element_type=jnp.float32)

        @pl.when(k == pl.num_programs(1) - 1)
        def _finalize():
            o_ref[...] = (acc_ref[...] + b2_ref[...]).astype(o_ref.dtype)

    return kernel


# ----------------------------------------------------------------------------
# wrapper: Chunk(chunks, FeedForward, along_dim=-2)(x)
# ----------------------------------------------------------------------------
def chunk_feedforward(x, w1, b1, w2, b2, *, chunks, tile_m=256,
                      mxu_dtype=jnp.bfloat16):
    """Pallas equivalent of Chunk(chunks, FeedForward, along_dim=-2)(x).

    The feed-forward is row-wise, so chunking along the sequence axis does not
    change the result; `chunks` is accepted for interface parity and the
    compute tile is chosen independently for performance.
    """
    assert chunks >= 1
    B, S, D = x.shape
    Din, H = w1.shape
    assert Din == D and w2.shape == (H, D) and b1.shape == (H,) and b2.shape == (D,)

    out_dtype = x.dtype
    mxu_dtype = jnp.dtype(mxu_dtype)
    is_bf16 = mxu_dtype == jnp.dtype(jnp.bfloat16)
    lane_align, vmem_limit, dual_tc = _tpu_config()

    # ---- collapse (B, S) into one MXU M dimension --------------------------
    M = B * S
    x2 = x.reshape(M, D)

    # ---- lane (last-dim) padding; rows stay ragged (pl.cdiv grid) ----------
    D_pad = _round_up(D, lane_align)
    H_pad0 = _round_up(H, lane_align)

    # row tile: multiple of 16 sublanes, not bigger than needed, and >= 2
    # grid steps on dual-TensorCore chips when the row count allows it.
    tm = max(16, min(_round_up(tile_m, 16), _round_up(M, 16)))
    if dual_tc and pl.cdiv(M, tm) < 2 and M > 16:
        tm = max(16, _round_up(pl.cdiv(M, 2), 16))
    num_m = pl.cdiv(M, tm)

    # H tile: bound VMEM independent of H (v7x has 64 MiB/TC).  Budget assumes
    # double-buffered streamed weights + f32 (tm, th) intermediate + f32 acc.
    bytes_mxu = mxu_dtype.itemsize
    bytes_out = jnp.dtype(out_dtype).itemsize
    budget = int(vmem_limit * 0.6)

    def _vmem_use(th):
        return (tm * D_pad * (2 * bytes_mxu + 2 * bytes_out + 4)   # x, out, acc
                + 2 * 2 * D_pad * th * bytes_mxu                   # W1+W2 (2-buf)
                + 2 * th * 4 + D_pad * 4                           # b1, b2
                + tm * th * 4)                                      # h intermediate

    th = H_pad0
    while th > lane_align and _vmem_use(th) > budget:
        th -= lane_align
    H_pad = _round_up(H_pad0, th)          # zero H-padding is exact: gelu(0)=0
    num_h = H_pad // th
    weights_resident = num_h == 1

    # GELU elementwise dtype: bf16 only on 256-MXU chips (bf16 VPU) for small D
    # where the VALU would otherwise bind; f32 everywhere else (incl. v5e).
    gelu_dtype = (jnp.bfloat16
                  if (is_bf16 and lane_align == 256 and D <= 400)
                  else jnp.float32)

    # ---- operand prep (lane pad + MXU-operand cast; biases stay f32) -------
    x_p = _pad2(x2, (M, D_pad)).astype(mxu_dtype)
    w1_p = _pad2(w1, (D_pad, H_pad)).astype(mxu_dtype)
    w2_p = _pad2(w2, (H_pad, D_pad)).astype(mxu_dtype)
    b1_p = _pad2(b1.reshape(1, H), (1, H_pad)).astype(jnp.float32)
    b2_p = _pad2(b2.reshape(1, D), (1, D_pad)).astype(jnp.float32)

    kernel = _make_ffn_kernel(gelu_dtype, mxu_dtype)
    grid = (num_m, num_h)

    cost = pl.CostEstimate(
        flops=4 * M * D_pad * H_pad,
        transcendentals=M * H_pad,
        bytes_accessed=(M * D_pad * (bytes_mxu + bytes_out)
                        + 2 * D_pad * H_pad * bytes_mxu
                        + 4 * (H_pad + D_pad)),
    )

    def _build_specs(single_buffer_const):
        def spec(shape, index_map, const):
            if const and single_buffer_const:
                return pl.BlockSpec(shape, index_map,
                                    pipeline_mode=pl.Buffered(1))
            return pl.BlockSpec(shape, index_map)

        in_specs = [
            pl.BlockSpec((tm, D_pad), lambda i, k: (i, 0)),            # x rows
            spec((D_pad, th), lambda i, k: (0, k), weights_resident),  # W1
            spec((1, th), lambda i, k: (0, k), weights_resident),      # b1
            spec((th, D_pad), lambda i, k: (k, 0), weights_resident),  # W2
            spec((1, D_pad), lambda i, k: (0, 0), True),               # b2 (const)
        ]
        out_specs = pl.BlockSpec((tm, D_pad), lambda i, k: (i, 0))
        return in_specs, out_specs

    def _run(single_buffer_const):
        in_specs, out_specs = _build_specs(single_buffer_const)
        return pl.pallas_call(
            kernel,
            out_shape=jax.ShapeDtypeStruct((M, D_pad), out_dtype),
            grid=grid,
            in_specs=in_specs,
            out_specs=out_specs,
            scratch_shapes=[pltpu.VMEM((tm, D_pad), jnp.float32)],
            compiler_params=pltpu.CompilerParams(
                dimension_semantics=("parallel", "arbitrary"),
                vmem_limit_bytes=vmem_limit,
            ),
            cost_estimate=cost,
        )(x_p, w1_p, b1_p, w2_p, b2_p)

    try:
        out = _run(True)          # single-buffer constant-index blocks
    except Exception:             # pragma: no cover — Buffered(1) fallback
        out = _run(False)

    if D_pad != D:
        out = out[:, :D]
    return out.reshape(B, S, D)


# ----------------------------------------------------------------------------
# pure-JAX reference reproducing the PyTorch Chunk semantics exactly
# ----------------------------------------------------------------------------
def _reference(x, w1, b1, w2, b2, *, chunks):
    def fn(c):
        h = _gelu_tanh(c @ w1 + b1)
        return h @ w2 + b2

    if chunks == 1:
        return fn(x)
    pieces = jnp.split(x, chunks, axis=-2)
    return jnp.concatenate([fn(c) for c in pieces], axis=-2)


# ----------------------------------------------------------------------------
if __name__ == "__main__":
    B, S, D, H = 2, 16, 32, 64
    CHUNKS = 2

    key = jax.random.PRNGKey(0)
    kx, k1, k2, k3, k4 = jax.random.split(key, 5)

    x = jax.random.normal(kx, (B, S, D), dtype=jnp.float32)
    w1 = jax.random.normal(k1, (D, H), dtype=jnp.float32) * (1.0 / math.sqrt(D))
    b1 = jax.random.normal(k2, (H,), dtype=jnp.float32) * 0.01
    w2 = jax.random.normal(k3, (H, D), dtype=jnp.float32) * (1.0 / math.sqrt(H))
    b2 = jax.random.normal(k4, (D,), dtype=jnp.float32) * 0.01

    ref = _reference(x, w1, b1, w2, b2, chunks=CHUNKS)

    # default path: bf16 MXU operands, f32 accumulation (loose tolerance)
    out = chunk_feedforward(x, w1, b1, w2, b2, chunks=CHUNKS)
    out = jax.block_until_ready(out)
    assert out.shape == (B, S, D)
    assert out.dtype == x.dtype
    assert jnp.allclose(out, ref, atol=1e-1, rtol=1e-1)

    # explicit f32 path — faithful to the module's math (tight tolerance)
    out_f32 = chunk_feedforward(
        x, w1, b1, w2, b2, chunks=CHUNKS, mxu_dtype=jnp.float32)
    out_f32 = jax.block_until_ready(out_f32)
    assert out_f32.shape == (B, S, D)
    assert jnp.allclose(out_f32, ref, atol=1e-4, rtol=1e-4)

    print("KERNEL_OK")
</pallas_src>

<mosaic_0001>
module attributes {stable_mosaic.version = 11 : i64} {
  func.func @kernel(%arg0: i32, %arg1: i32, %arg2: memref<32x128xbf16, #tpu.memory_space<vmem>>, %arg3: memref<128x128xbf16, #tpu.memory_space<vmem>>, %arg4: memref<1x128xf32, #tpu.memory_space<vmem>>, %arg5: memref<128x128xbf16, #tpu.memory_space<vmem>>, %arg6: memref<1x128xf32, #tpu.memory_space<vmem>>, %arg7: memref<32x128xf32, #tpu.memory_space<vmem>>, %arg8: memref<32x128xf32, #tpu.memory_space<vmem>>) attributes {dimension_semantics = [#tpu.dimension_semantics<parallel>, #tpu.dimension_semantics<arbitrary>], iteration_bounds = array<i64: 1, 1>, scalar_prefetch = 0 : i64, scratch_operands = 1 : i64, tpu.core_type = #tpu.core_type<tc>, window_params = [{transform_indices = @transform_0, window_bounds = array<i64: 32, 128>}, {pipeline_mode = #tpu.pipeline_mode<synchronous>, transform_indices = @transform_1, window_bounds = array<i64: 128, 128>}, {pipeline_mode = #tpu.pipeline_mode<synchronous>, transform_indices = @transform_2, window_bounds = array<i64: 1, 128>}, {pipeline_mode = #tpu.pipeline_mode<synchronous>, transform_indices = @transform_3, window_bounds = array<i64: 128, 128>}, {pipeline_mode = #tpu.pipeline_mode<synchronous>, transform_indices = @transform_4, window_bounds = array<i64: 1, 128>}, {transform_indices = @transform_5, window_bounds = array<i64: 32, 128>}]} {
    %c0_i32 = arith.constant 0 : i32
    %0 = arith.cmpi eq, %arg1, %c0_i32 : i32
    %1 = arith.extui %0 : i1 to i32
    %c0_i32_0 = arith.constant 0 : i32
    %2 = arith.cmpi ne, %1, %c0_i32_0 : i32
    scf.if %2 {
      %cst_19 = arith.constant 0.000000e+00 : f32
      %31 = vector.broadcast %cst_19 : f32 to vector<32x128xf32>
      %c0_20 = arith.constant 0 : index
      %c0_21 = arith.constant 0 : index
      %32 = vector.load %arg8[%c0_20, %c0_21] : memref<32x128xf32, #tpu.memory_space<vmem>>, vector<32x128xf32>
      tpu.vector_store %arg8[%c0_20, %c0_21], %31 {strides = array<i32>} : memref<32x128xf32, #tpu.memory_space<vmem>>, vector<32x128xf32>,
    } else {
    }
    %c0 = arith.constant 0 : index
    %c0_1 = arith.constant 0 : index
    %3 = vector.load %arg2[%c0, %c0_1] : memref<32x128xbf16, #tpu.memory_space<vmem>>, vector<32x128xbf16>
    %c0_2 = arith.constant 0 : index
    %c0_3 = arith.constant 0 : index
    %4 = vector.load %arg3[%c0_2, %c0_3] : memref<128x128xbf16, #tpu.memory_space<vmem>>, vector<128x128xbf16>
    %cst = arith.constant dense<0.000000e+00> : vector<32x128xf32>
    %5 = tpu.matmul %3, %4, %cst {dimension_numbers = #tpu.dot_dimension_numbers<[1], [0], [0], [1], [0, 0, 1, 1], [], []>} : vector<32x128xbf16>, vector<128x128xbf16>, vector<32x128xf32> -> vector<32x128xf32>
    %c0_4 = arith.constant 0 : index
    %c0_5 = arith.constant 0 : index
    %6 = vector.load %arg4[%c0_4, %c0_5] : memref<1x128xf32, #tpu.memory_space<vmem>>, vector<1x128xf32>
    %7 = vector.broadcast %6 : vector<1x128xf32> to vector<32x128xf32>
    %8 = arith.addf %5, %7 : vector<32x128xf32>
    %cst_6 = arith.constant 5.000000e-01 : f32
    %9 = vector.broadcast %cst_6 : f32 to vector<32x128xf32>
    %10 = arith.mulf %9, %8 : vector<32x128xf32>
    %cst_7 = arith.constant 4.471500e-02 : f32
    %11 = vector.broadcast %cst_7 : f32 to vector<32x128xf32>
    %12 = arith.mulf %11, %8 : vector<32x128xf32>
    %13 = arith.mulf %12, %8 : vector<32x128xf32>
    %14 = arith.mulf %13, %8 : vector<32x128xf32>
    %15 = arith.addf %8, %14 : vector<32x128xf32>
    %cst_8 = arith.constant 0.797884583 : f32
    %16 = vector.broadcast %cst_8 : f32 to vector<32x128xf32>
    %17 = arith.mulf %16, %15 : vector<32x128xf32>
    %18 = math.tanh %17 : vector<32x128xf32>
    %cst_9 = arith.constant 1.000000e+00 : f32
    %19 = vector.broadcast %cst_9 : f32 to vector<32x128xf32>
    %20 = arith.addf %19, %18 : vector<32x128xf32>
    %21 = arith.mulf %10, %20 : vector<32x128xf32>
    %c0_10 = arith.constant 0 : index
    %c0_11 = arith.constant 0 : index
    %22 = vector.load %arg8[%c0_10, %c0_11] : memref<32x128xf32, #tpu.memory_space<vmem>>, vector<32x128xf32>
    %23 = arith.truncf %21 : vector<32x128xf32> to vector<32x128xbf16>
    %c0_12 = arith.constant 0 : index
    %c0_13 = arith.constant 0 : index
    %24 = vector.load %arg5[%c0_12, %c0_13] : memref<128x128xbf16, #tpu.memory_space<vmem>>, vector<128x128xbf16>
    %cst_14 = arith.constant dense<0.000000e+00> : vector<32x128xf32>
    %25 = tpu.matmul %23, %24, %cst_14 {dimension_numbers = #tpu.dot_dimension_numbers<[1], [0], [0], [1], [0, 0, 1, 1], [], []>} : vector<32x128xbf16>, vector<128x128xbf16>, vector<32x128xf32> -> vector<32x128xf32>
    %26 = arith.addf %22, %25 : vector<32x128xf32>
    %c0_15 = arith.constant 0 : index
    %c0_16 = arith.constant 0 : index
    %27 = vector.load %arg8[%c0_15, %c0_16] : memref<32x128xf32, #tpu.memory_space<vmem>>, vector<32x128xf32>
    tpu.vector_store %arg8[%c0_15, %c0_16], %26 {strides = array<i32>} : memref<32x128xf32, #tpu.memory_space<vmem>>, vector<32x128xf32>,
    %c0_i32_17 = arith.constant 0 : i32
    %28 = arith.cmpi eq, %arg1, %c0_i32_17 : i32
    %29 = arith.extui %28 : i1 to i32
    %c0_i32_18 = arith.constant 0 : i32
    %30 = arith.cmpi ne, %29, %c0_i32_18 : i32
    scf.if %30 {
      %c0_19 = arith.constant 0 : index
      %c0_20 = arith.constant 0 : index
      %31 = vector.load %arg8[%c0_19, %c0_20] : memref<32x128xf32, #tpu.memory_space<vmem>>, vector<32x128xf32>
      %c0_21 = arith.constant 0 : index
      %c0_22 = arith.constant 0 : index
      %32 = vector.load %arg6[%c0_21, %c0_22] : memref<1x128xf32, #tpu.memory_space<vmem>>, vector<1x128xf32>
      %33 = vector.broadcast %32 : vector<1x128xf32> to vector<32x128xf32>
      %34 = arith.addf %31, %33 : vector<32x128xf32>
      %c0_23 = arith.constant 0 : index
      %c0_24 = arith.constant 0 : index
      %35 = vector.load %arg7[%c0_23, %c0_24] : memref<32x128xf32, #tpu.memory_space<vmem>>, vector<32x128xf32>
      tpu.vector_store %arg7[%c0_23, %c0_24], %34 {strides = array<i32>} : memref<32x128xf32, #tpu.memory_space<vmem>>, vector<32x128xf32>,
    } else {
    }
    return
  }
  func.func @transform_0(%arg0: i32, %arg1: i32) -> (i32, i32) {
    %c0_i32 = arith.constant 0 : i32
    %c0_i32_0 = arith.constant 0 : i32
    return %arg0, %c0_i32 : i32, i32
  }
  func.func @transform_1(%arg0: i32, %arg1: i32) -> (i32, i32) {
    %c0_i32 = arith.constant 0 : i32
    %c0_i32_0 = arith.constant 0 : i32
    return %c0_i32, %arg1 : i32, i32
  }
  func.func @transform_2(%arg0: i32, %arg1: i32) -> (i32, i32) {
    %c0_i32 = arith.constant 0 : i32
    %c0_i32_0 = arith.constant 0 : i32
    return %c0_i32, %arg1 : i32, i32
  }
  func.func @transform_3(%arg0: i32, %arg1: i32) -> (i32, i32) {
    %c0_i32 = arith.constant 0 : i32
    %c0_i32_0 = arith.constant 0 : i32
    return %arg1, %c0_i32 : i32, i32
  }
  func.func @transform_4(%arg0: i32, %arg1: i32) -> (i32, i32) {
    %c0_i32 = arith.constant 0 : i32
    %c0_i32_0 = arith.constant 0 : i32
    %c0_i32_1 = arith.constant 0 : i32
    return %c0_i32, %c0_i32_0 : i32, i32
  }
  func.func @transform_5(%arg0: i32, %arg1: i32) -> (i32, i32) {
    %c0_i32 = arith.constant 0 : i32
    %c0_i32_0 = arith.constant 0 : i32
    return %arg0, %c0_i32 : i32, i32
  }
}

module attributes {stable_mosaic.version = 11 : i64} {
  func.func @kernel(%arg0: i32, %arg1: i32, %arg2: memref<32x128xbf16, #tpu.memory_space<vmem>>, %arg3: memref<128x128xbf16, #tpu.memory_space<vmem>>, %arg4: memref<1x128xf32, #tpu.memory_space<vmem>>, %arg5: memref<128x128xbf16, #tpu.memory_space<vmem>>, %arg6: memref<1x128xf32, #tpu.memory_space<vmem>>, %arg7: memref<32x128xf32, #tpu.memory_space<vmem>>, %arg8: memref<32x128xf32, #tpu.memory_space<vmem>>) attributes {dimension_semantics = [#tpu.dimension_semantics<parallel>, #tpu.dimension_semantics<arbitrary>], iteration_bounds = array<i64: 1, 1>, scalar_prefetch = 0 : i64, scratch_operands = 1 : i64, tpu.core_type = #tpu.core_type<tc>, window_params = [{transform_indices = @transform_0, window_bounds = array<i64: 32, 128>}, {transform_indices = @transform_1, window_bounds = array<i64: 128, 128>}, {transform_indices = @transform_2, window_bounds = array<i64: 1, 128>}, {transform_indices = @transform_3, window_bounds = array<i64: 128, 128>}, {pipeline_mode = #tpu.pipeline_mode<synchronous>, transform_indices = @transform_4, window_bounds = array<i64: 1, 128>}, {transform_indices = @transform_5, window_bounds = array<i64: 32, 128>}]} {
    %c0_i32 = arith.constant 0 : i32
    %0 = arith.cmpi eq, %arg1, %c0_i32 : i32
    %1 = arith.extui %0 : i1 to i32
    %c0_i32_0 = arith.constant 0 : i32
    %2 = arith.cmpi ne, %1, %c0_i32_0 : i32
    scf.if %2 {
      %cst_19 = arith.constant 0.000000e+00 : f32
      %31 = vector.broadcast %cst_19 : f32 to vector<32x128xf32>
      %c0_20 = arith.constant 0 : index
      %c0_21 = arith.constant 0 : index
      %32 = vector.load %arg8[%c0_20, %c0_21] : memref<32x128xf32, #tpu.memory_space<vmem>>, vector<32x128xf32>
      tpu.vector_store %arg8[%c0_20, %c0_21], %31 {strides = array<i32>} : memref<32x128xf32, #tpu.memory_space<vmem>>, vector<32x128xf32>,
    } else {
    }
    %c0 = arith.constant 0 : index
    %c0_1 = arith.constant 0 : index
    %3 = vector.load %arg2[%c0, %c0_1] : memref<32x128xbf16, #tpu.memory_space<vmem>>, vector<32x128xbf16>
    %c0_2 = arith.constant 0 : index
    %c0_3 = arith.constant 0 : index
    %4 = vector.load %arg3[%c0_2, %c0_3] : memref<128x128xbf16, #tpu.memory_space<vmem>>, vector<128x128xbf16>
    %cst = arith.constant dense<0.000000e+00> : vector<32x128xf32>
    %5 = tpu.matmul %3, %4, %cst {dimension_numbers = #tpu.dot_dimension_numbers<[1], [0], [0], [1], [0, 0, 1, 1], [], []>} : vector<32x128xbf16>, vector<128x128xbf16>, vector<32x128xf32> -> vector<32x128xf32>
    %c0_4 = arith.constant 0 : index
    %c0_5 = arith.constant 0 : index
    %6 = vector.load %arg4[%c0_4, %c0_5] : memref<1x128xf32, #tpu.memory_space<vmem>>, vector<1x128xf32>
    %7 = vector.broadcast %6 : vector<1x128xf32> to vector<32x128xf32>
    %8 = arith.addf %5, %7 : vector<32x128xf32>
    %cst_6 = arith.constant 5.000000e-01 : f32
    %9 = vector.broadcast %cst_6 : f32 to vector<32x128xf32>
    %10 = arith.mulf %9, %8 : vector<32x128xf32>
    %cst_7 = arith.constant 4.471500e-02 : f32
    %11 = vector.broadcast %cst_7 : f32 to vector<32x128xf32>
    %12 = arith.mulf %11, %8 : vector<32x128xf32>
    %13 = arith.mulf %12, %8 : vector<32x128xf32>
    %14 = arith.mulf %13, %8 : vector<32x128xf32>
    %15 = arith.addf %8, %14 : vector<32x128xf32>
    %cst_8 = arith.constant 0.797884583 : f32
    %16 = vector.broadcast %cst_8 : f32 to vector<32x128xf32>
    %17 = arith.mulf %16, %15 : vector<32x128xf32>
    %18 = math.tanh %17 : vector<32x128xf32>
    %cst_9 = arith.constant 1.000000e+00 : f32
    %19 = vector.broadcast %cst_9 : f32 to vector<32x128xf32>
    %20 = arith.addf %19, %18 : vector<32x128xf32>
    %21 = arith.mulf %10, %20 : vector<32x128xf32>
    %c0_10 = arith.constant 0 : index
    %c0_11 = arith.constant 0 : index
    %22 = vector.load %arg8[%c0_10, %c0_11] : memref<32x128xf32, #tpu.memory_space<vmem>>, vector<32x128xf32>
    %23 = arith.truncf %21 : vector<32x128xf32> to vector<32x128xbf16>
    %c0_12 = arith.constant 0 : index
    %c0_13 = arith.constant 0 : index
    %24 = vector.load %arg5[%c0_12, %c0_13] : memref<128x128xbf16, #tpu.memory_space<vmem>>, vector<128x128xbf16>
    %cst_14 = arith.constant dense<0.000000e+00> : vector<32x128xf32>
    %25 = tpu.matmul %23, %24, %cst_14 {dimension_numbers = #tpu.dot_dimension_numbers<[1], [0], [0], [1], [0, 0, 1, 1], [], []>} : vector<32x128xbf16>, vector<128x128xbf16>, vector<32x128xf32> -> vector<32x128xf32>
    %26 = arith.addf %22, %25 : vector<32x128xf32>
    %c0_15 = arith.constant 0 : index
    %c0_16 = arith.constant 0 : index
    %27 = vector.load %arg8[%c0_15, %c0_16] : memref<32x128xf32, #tpu.memory_space<vmem>>, vector<32x128xf32>
    tpu.vector_store %arg8[%c0_15, %c0_16], %26 {strides = array<i32>} : memref<32x128xf32, #tpu.memory_space<vmem>>, vector<32x128xf32>,
    %c0_i32_17 = arith.constant 0 : i32
    %28 = arith.cmpi eq, %arg1, %c0_i32_17 : i32
    %29 = arith.extui %28 : i1 to i32
    %c0_i32_18 = arith.constant 0 : i32
    %30 = arith.cmpi ne, %29, %c0_i32_18 : i32
    scf.if %30 {
      %c0_19 = arith.constant 0 : index
      %c0_20 = arith.constant 0 : index
      %31 = vector.load %arg8[%c0_19, %c0_20] : memref<32x128xf32, #tpu.memory_space<vmem>>, vector<32x128xf32>
      %c0_21 = arith.constant 0 : index
      %c0_22 = arith.constant 0 : index
      %32 = vector.load %arg6[%c0_21, %c0_22] : memref<1x128xf32, #tpu.memory_space<vmem>>, vector<1x128xf32>
      %33 = vector.broadcast %32 : vector<1x128xf32> to vector<32x128xf32>
      %34 = arith.addf %31, %33 : vector<32x128xf32>
      %c0_23 = arith.constant 0 : index
      %c0_24 = arith.constant 0 : index
      %35 = vector.load %arg7[%c0_23, %c0_24] : memref<32x128xf32, #tpu.memory_space<vmem>>, vector<32x128xf32>
      tpu.vector_store %arg7[%c0_23, %c0_24], %34 {strides = array<i32>} : memref<32x128xf32, #tpu.memory_space<vmem>>, vector<32x128xf32>,
    } else {
    }
    return
  }
  func.func @transform_0(%arg0: i32, %arg1: i32) -> (i32, i32) {
    %c0_i32 = arith.constant 0 : i32
    %c0_i32_0 = arith.constant 0 : i32
    return %arg0, %c0_i32 : i32, i32
  }
  func.func @transform_1(%arg0: i32, %arg1: i32) -> (i32, i32) {
    %c0_i32 = arith.constant 0 : i32
    %c0_i32_0 = arith.constant 0 : i32
    return %c0_i32, %arg1 : i32, i32
  }
  func.func @transform_2(%arg0: i32, %arg1: i32) -> (i32, i32) {
    %c0_i32 = arith.constant 0 : i32
    %c0_i32_0 = arith.constant 0 : i32
    return %c0_i32, %arg1 : i32, i32
  }
  func.func @transform_3(%arg0: i32, %arg1: i32) -> (i32, i32) {
    %c0_i32 = arith.constant 0 : i32
    %c0_i32_0 = arith.constant 0 : i32
    return %arg1, %c0_i32 : i32, i32
  }
  func.func @transform_4(%arg0: i32, %arg1: i32) -> (i32, i32) {
    %c0_i32 = arith.constant 0 : i32
    %c0_i32_0 = arith.constant 0 : i32
    %c0_i32_1 = arith.constant 0 : i32
    return %c0_i32, %c0_i32_0 : i32, i32
  }
  func.func @transform_5(%arg0: i32, %arg1: i32) -> (i32, i32) {
    %c0_i32 = arith.constant 0 : i32
    %c0_i32_0 = arith.constant 0 : i32
    return %arg0, %c0_i32 : i32, i32
  }
}

</mosaic_0001>

<bundles_post_ra>
// kernel: tpu_custom_call.1
= control target key start
LH: loop header
LB: loop body
LE: loop exit
PB: predicated region body
PF: predicated region fallthrough
CT: control target
= control target key end

     0   :  { %10 = vsyncpa [#allocation4], 0  ;;  %s666_s0 = inlined_call_operand.hbm [shape: bf16[32,128], index: 0, kind: input, shape index: {}]   ;;  %s667_s1 = inlined_call_operand.hbm [shape: bf16[128,128], index: 1, kind: input, shape index: {}]   ;;  %s668_s2 = inlined_call_operand.vmem [shape: f32[1,128], index: 2, kind: input, shape index: {}]   ;;  %s669_s3 = inlined_call_operand.hbm [shape: bf16[128,128], index: 3, kind: input, shape index: {}]   ;;  %s670_s4 = inlined_call_operand.vmem [shape: f32[1,128], index: 4, kind: input, shape index: {}]   ;;  %s671_s5 = inlined_call_operand.hbm [shape: f32[32,128], index: 5, kind: output, shape index: {}]  }
   0x1   :  { %11 = vsyncpa [#allocation7], 0 }
   0x2   :  { %12 = vsyncpa [#allocation5], 0  ;;  %s610_s18 = smov [#allocation6]   ;;  %s611_s20 = smov [#allocation3]  }
   0x3   :  { %s30_s19 = sshll.u32 %s610_s18, 4  ;;  %s18_s21 = sshll.u32 %s611_s20, 4  ;;  %s31_s19 = int_to_ptr.vmem [resolvable:$true] %s30_s19  ;;  %s19_s21 = int_to_ptr.vmem [resolvable:$true] %s18_s21 }
   0x4   :  { %s532_s22 = scalar_lea.vmem %s31_s19, 1024  ;;  %p537_p1 = scmp.lt.s32.totalorder %s31_s19, %s31_s19 }
   0x5   :  { %p533_p0 = scmp.ne.s32.totalorder %s31_s19, %s532_s22  ;;  %p538_p2 = scmp.lt.s32.totalorder %s532_s22, %s532_s22 }
   0x7   :  { %p539_p3 = por %p538_p2, %p537_p1 }
   0x9   :  { %p540_p4 = pnand %p539_p3, %p533_p0 }
   0xb   :  { %543 = shalt.err (!%p540_p4)
}
   0xc   :  { %s612_s23 = smov 64   ;;  %s613_s24 = smov 4  }
   0xd   :  { %36 = dma.hbm_to_vmem [thread:$0]  %s667_s1, 1024, %s31_s19, [#allocation7], %s612_s23, %s612_s23, %s613_s24  }
   0xe   :  { %s552_s27 = scalar_lea.vmem %s19_s21, 256  ;;  %p557_p6 = scmp.lt.s32.totalorder %s19_s21, %s19_s21 }
   0xf   :  { %p553_p5 = scmp.ne.s32.totalorder %s19_s21, %s552_s27  ;;  %p558_p7 = scmp.lt.s32.totalorder %s552_s27, %s552_s27 }
  0x11   :  { %p559_p8 = por %p558_p7, %p557_p6 }
  0x13   :  { %p560_p9 = pnand %p559_p8, %p553_p5 }
  0x15   :  { %563 = shalt.err (!%p560_p9)
}
  0x16   :  { %24 = dma.hbm_to_vmem [thread:$0]  %s666_s0, 256, %s19_s21, [#allocation4], %s612_s23, %s612_s23, %s613_s24  }
  0x17   :  { %s614_s30 = smov [#allocation8]  }
  0x18   :  { %s44_s6 = sshll.u32 %s614_s30, 4  ;;  %s45_s6 = int_to_ptr.vmem [resolvable:$true] %s44_s6 }
  0x19   :  { %s572_s7 = scalar_lea.vmem %s45_s6, 1024  ;;  %p577_p11 = scmp.lt.s32.totalorder %s45_s6, %s45_s6 }
  0x1a   :  { %p573_p10 = scmp.ne.s32.totalorder %s45_s6, %s572_s7  ;;  %p578_p12 = scmp.lt.s32.totalorder %s572_s7, %s572_s7 }
  0x1c   :  { %p579_p13 = por %p578_p12, %p577_p11 }
  0x1e   :  { %p580_p0 = pnand %p579_p13, %p573_p10 }
  0x20   :  { %583 = shalt.err (!%p580_p0)
}
  0x21   :  { %50 = dma.hbm_to_vmem [thread:$0]  %s669_s3, 1024, %s45_s6, [#allocation7], %s612_s23, %s612_s23, %s613_s24  }
  0x22   :  { %604 = dma.done.wait [#allocation4], 256  }
  0x23   :  { %605 = vsyncadd [#allocation4], 4294967040 }
  0x24   :  { %606 = dma.done.wait [#allocation7], 2048  }
  0x25   :  { %607 = vsyncadd [#allocation7], 4294965248  ;;  %v498_v0 = vld [vmem:[#allocation6 + $0x38] sm:$0xff]   ;;  %v499_v1 = vld [vmem:[#allocation6 + $0x30] sm:$0xff]   ;;  %s615_s10 = smov [#allocation9]  }
  0x26   :  { %450 = vmatprep.subr.bf16.mxu0 %v498_v0  ;;  %v500_v2 = vld [vmem:[#allocation6 + $0x28] sm:$0xff]   ;;  %v501_v3 = vld [vmem:[#allocation6 + $0x20] sm:$0xff]   ;;  %v506_v4 = vld [vmem:[#allocation3] sm:$0xff]   ;;  %s397_s11 = sshll.u32 %s615_s10, 4  ;;  %s398_s11 = int_to_ptr.vmem [resolvable:$true] %s397_s11 }
  0x27   :  { %451 = vmatpush3.bf16.msra.mxu0 %v498_v0  ;;  %v502_v5 = vld [vmem:[#allocation6 + $0x18] sm:$0xff]   ;;  %466 = vmatprep.mubr.bf16.mxu0 %v506_v4  ;;  %v503_v6 = vld [vmem:[#allocation6 + $0x10] sm:$0xff]   ;;  %v504_v7 = vld [vmem:[#allocation6 + $0x8] sm:$0xff]   ;;  %s584_s12 = scalar_lea.vmem %s398_s11, 512  ;;  %p589_p2 = scmp.lt.s32.totalorder %s398_s11, %s398_s11 }
  0x28   :  { %452 = vmatprep.subr.bf16.mxu0 %v499_v1  ;;  %v505_v8 = vld [vmem:[#allocation6] sm:$0xff]   ;;  %v507_v9 = vld [vmem:[#allocation3 + $0x8] sm:$0xff]   ;;  %v509_v11 = vld [vmem:[#allocation8 + $0x30] sm:$0xff]   ;;  %p585_p1 = scmp.ne.s32.totalorder %s398_s11, %s584_s12  ;;  %p590_p3 = scmp.lt.s32.totalorder %s584_s12, %s584_s12 }
  0x29   :  { %v508_v10 = vld [vmem:[#allocation8 + $0x38] sm:$0xff]   ;;  %v510_v12 = vld [vmem:[#allocation8 + $0x28] sm:$0xff]   ;;  %v511_v13 = vld [vmem:[#allocation8 + $0x20] sm:$0xff]  }
  0x2a   :  { %470 = vmatprep.subr.bf16.mxu1 %v508_v10  ;;  %v512_v14 = vld [vmem:[#allocation8 + $0x18] sm:$0xff]   ;;  %v513_v15 = vld [vmem:[#allocation8 + $0x10] sm:$0xff]   ;;  %v514_v16 = vld [vmem:[#allocation8 + $0x8] sm:$0xff]   ;;  %p591_p4 = por %p590_p3, %p589_p2 }
  0x2b   :  { %453 = vmatpush3.bf16.msra.mxu0 %v499_v1  ;;  %471 = vmatpush3.bf16.msra.mxu1 %v508_v10  ;;  %v515_v17 = vld [vmem:[#allocation8] sm:$0xff]   ;;  %v410_v18 = vld [vmem:[%s668_s2] ss:$0 sm:$0xff] }
  0x2c   :  { %454 = vmatprep.subr.bf16.mxu0 %v500_v2  ;;  %472 = vmatprep.subr.bf16.mxu1 %v509_v11  ;;  %v429_v1 = vld [vmem:[%s670_s4] ss:$0 sm:$0xff]  ;;  %p592_p5 = pnand %p591_p4, %p585_p1 }
  0x2f   :  { %455 = vmatpush3.bf16.msra.mxu0 %v500_v2  ;;  %473 = vmatpush3.bf16.msra.mxu1 %v509_v11 }
  0x30   :  { %456 = vmatprep.subr.bf16.mxu0 %v501_v3  ;;  %474 = vmatprep.subr.bf16.mxu1 %v510_v12 }
  0x33   :  { %457 = vmatpush3.bf16.msra.mxu0 %v501_v3  ;;  %475 = vmatpush3.bf16.msra.mxu1 %v510_v12 }
  0x34   :  { %458 = vmatprep.subr.bf16.mxu0 %v502_v5  ;;  %476 = vmatprep.subr.bf16.mxu1 %v511_v13 }
  0x37   :  { %459 = vmatpush3.bf16.msra.mxu0 %v502_v5  ;;  %477 = vmatpush3.bf16.msra.mxu1 %v511_v13 }
  0x38   :  { %460 = vmatprep.subr.bf16.mxu0 %v503_v6  ;;  %478 = vmatprep.subr.bf16.mxu1 %v512_v14 }
  0x3b   :  { %461 = vmatpush3.bf16.msra.mxu0 %v503_v6  ;;  %479 = vmatpush3.bf16.msra.mxu1 %v512_v14 }
  0x3c   :  { %462 = vmatprep.subr.bf16.mxu0 %v504_v7  ;;  %480 = vmatprep.subr.bf16.mxu1 %v513_v15 }
  0x3f   :  { %463 = vmatpush3.bf16.msra.mxu0 %v504_v7  ;;  %481 = vmatpush3.bf16.msra.mxu1 %v513_v15 }
  0x40   :  { %464 = vmatprep.subr.bf16.mxu0 %v505_v8  ;;  %482 = vmatprep.subr.bf16.mxu1 %v514_v16 }
  0x43   :  { %465 = vmatpush3.bf16.msra.mxu0 %v505_v8  ;;  %483 = vmatpush3.bf16.msra.mxu1 %v514_v16 }
  0x44   :  { %484 = vmatprep.subr.bf16.mxu1 %v515_v17 }
  0x46   :  { %467 = vmatmul.mubr.bf16.vlgmr.msra.gmra.mxu0 %v507_v9 }
  0x47   :  { %485 = vmatpush3.bf16.msra.mxu1 %v515_v17 }
 0x106   :  { %v468_v19 = vpop.f32.mrf.mxu0 }
 0x107   :  { %v201_v20 = vadd.f32 %v468_v19, %v410_v18 }
 0x108   :  { %v192_v21 = vpop.f32.mrf.mxu0 }
 0x109   :  { %v213_v22 = vmul.f32 0.044715, %v201_v20  ;;  %v193_v23 = vadd.f32 %v410_v18, %v192_v21  ;;  %v209_v58 = vmul.f32 0.5, %v201_v20 }
 0x10a   :  { %v469_v24 = vpop.f32.mrf.mxu0 }
 0x10b   :  { %v217_v25 = vmul.f32 %v213_v22, %v201_v20  ;;  %v211_v26 = vmul.f32 0.044715, %v193_v23  ;;  %v204_v27 = vadd.f32 %v469_v24, %v410_v18  ;;  %v207_v55 = vmul.f32 0.5, %v193_v23 }
 0x10c   :  { %v195_v28 = vpop.f32.mrf.mxu0 }
 0x10d   :  { %v221_v29 = vmul.f32 %v217_v25, %v201_v20  ;;  %v214_v30 = vmul.f32 0.044715, %v204_v27  ;;  %v196_v31 = vadd.f32 %v410_v18, %v195_v28  ;;  %v215_v32 = vmul.f32 %v211_v26, %v193_v23 }
 0x10e   :  { %v210_v53 = vmul.f32 0.5, %v204_v27 }
 0x10f   :  { %v218_v33 = vmul.f32 %v214_v30, %v204_v27  ;;  %v212_v34 = vmul.f32 0.044715, %v196_v31  ;;  %v219_v35 = vmul.f32 %v215_v32, %v193_v23  ;;  %v225_v36 = vadd.f32 %v221_v29, %v201_v20 }
 0x110   :  { %v208_v56 = vmul.f32 0.5, %v196_v31 }
 0x111   :  { %v222_v37 = vmul.f32 %v218_v33, %v204_v27  ;;  %v216_v38 = vmul.f32 %v212_v34, %v196_v31  ;;  %v223_v39 = vadd.f32 %v219_v35, %v193_v23  ;;  %v229_v40 = vmul.f32 0.7978846, %v225_v36 }
 0x113   :  { %v220_v41 = vmul.f32 %v216_v38, %v196_v31  ;;  %v227_v42 = vmul.f32 0.7978846, %v223_v39  ;;  %v226_v43 = vadd.f32 %v222_v37, %v204_v27 }
 0x115   :  { %v224_v44 = vadd.f32 %v220_v41, %v196_v31  ;;  %516 = vtanh.f32 %v227_v42  ;;  %v230_v45 = vmul.f32 0.7978846, %v226_v43 }
 0x116   :  { %518 = vtanh.f32 %v229_v40 }
 0x117   :  { %v228_v46 = vmul.f32 0.7978846, %v224_v44  ;;  %520 = vtanh.f32 %v230_v45 }
 0x119   :  { %522 = vtanh.f32 %v228_v46 }
 0x122   :  { %v517_v47 = vpop.eup %516 }
 0x123   :  { %v519_v48 = vpop.eup %518  ;;  %v235_v50 = vadd.f32 1.0, %v517_v47 }
 0x124   :  { %v521_v49 = vpop.eup %520  ;;  %v237_v54 = vadd.f32 1.0, %v519_v48 }
 0x125   :  { %v238_v51 = vadd.f32 1.0, %v521_v49  ;;  %v239_v60 = vmul.f32 %v235_v50, %v207_v55 }
 0x126   :  { %v523_v52 = vpop.eup %522  ;;  %v241_v62 = vmul.f32 %v237_v54, %v209_v58 }
 0x127   :  { %v236_v57 = vadd.f32 1.0, %v523_v52  ;;  %v242_v59 = vmul.f32 %v238_v51, %v210_v53 }
 0x129   :  { %v240_v61 = vmul.f32 %v236_v57, %v208_v56  ;;  %v248_v0 = vpack.c.bf16 %v242_v59, %v241_v62 }
 0x12b   :  { %v247_v63 = vpack.c.bf16 %v240_v61, %v239_v60 }
 0x12d   :  { %486 = vmatprep.mubr.bf16.mxu1 %v247_v63 }
 0x12e   :  { %487 = vmatmul.mubr.bf16.vlgmr.msra.gmra.mxu1 %v248_v0 }
 0x1ee   :  { %v488_v2 = vpop.f32.mrf.mxu1 }
 0x1ef   :  { %v386_v3 = vadd.f32 %v488_v2, %v429_v1 }
 0x1f0   :  { %v347_v4 = vpop.f32.mrf.mxu1 }
 0x1f1   :  { %390 = vst [vmem:[#allocation9 + $0x10] sm:$0xff] %v386_v3  ;;  %v384_v5 = vadd.f32 %v429_v1, %v347_v4 }
 0x1f2   :  { %v489_v6 = vpop.f32.mrf.mxu1 }
 0x1f3   :  { %388 = vst [vmem:[#allocation9] sm:$0xff] %v384_v5  ;;  %v387_v7 = vadd.f32 %v489_v6, %v429_v1 }
 0x1f4   :  { %v350_v8 = vpop.f32.mrf.mxu1 }
 0x1f5   :  { %391 = vst [vmem:[#allocation9 + $0x18] sm:$0xff] %v387_v7  ;;  %v385_v9 = vadd.f32 %v429_v1, %v350_v8 }
 0x1f7   :  { %389 = vst [vmem:[#allocation9 + $0x8] sm:$0xff] %v385_v9 }
 0x1f8   :  { %595 = shalt.err (!%p592_p5)
}
 0x1f9   :  { %s616_s4 = smov 128   ;;  %s617_s13 = smov 8  }
 0x1fa   :  { %403 = dma.vmem_to_hbm [thread:$0]  %s398_s11, 512, %s671_s5, [#allocation5], %s616_s4, %s616_s4, %s617_s13  }
 0x1fb   :  { %608 = dma.done.wait [#allocation5], 512  }
 0x1fc   :  { %609 = vsyncadd [#allocation5], 4294966784 }
 0x1fd   :  { %407 = vsyncpa [#allocation4], 1 }
 0x1fe   :  { %408 = vsyncpa [#allocation7], 1 }
 0x1ff   :  { %409 = vsyncpa [#allocation5], 1 }

// kernel: tpu_custom_call.1
= control target key start
LH: loop header
LB: loop body
LE: loop exit
PB: predicated region body
PF: predicated region fallthrough
CT: control target
= control target key end

     0   :  { %10 = vsyncpa [#allocation4], 0  ;;  %s666_s0 = inlined_call_operand.hbm [shape: bf16[32,128], index: 0, kind: input, shape index: {}]   ;;  %s667_s1 = inlined_call_operand.hbm [shape: bf16[128,128], index: 1, kind: input, shape index: {}]   ;;  %s668_s2 = inlined_call_operand.vmem [shape: f32[1,128], index: 2, kind: input, shape index: {}]   ;;  %s669_s3 = inlined_call_operand.hbm [shape: bf16[128,128], index: 3, kind: input, shape index: {}]   ;;  %s670_s4 = inlined_call_operand.vmem [shape: f32[1,128], index: 4, kind: input, shape index: {}]   ;;  %s671_s5 = inlined_call_operand.hbm [shape: f32[32,128], index: 5, kind: output, shape index: {}]  }
   0x1   :  { %11 = vsyncpa [#allocation7], 0 }
   0x2   :  { %12 = vsyncpa [#allocation5], 0  ;;  %s610_s18 = smov [#allocation6]   ;;  %s611_s20 = smov [#allocation3]  }
   0x3   :  { %s30_s19 = sshll.u32 %s610_s18, 4  ;;  %s18_s21 = sshll.u32 %s611_s20, 4  ;;  %s31_s19 = int_to_ptr.vmem [resolvable:$true] %s30_s19  ;;  %s19_s21 = int_to_ptr.vmem [resolvable:$true] %s18_s21 }
   0x4   :  { %s532_s22 = scalar_lea.vmem %s31_s19, 1024  ;;  %p537_p1 = scmp.lt.s32.totalorder %s31_s19, %s31_s19 }
   0x5   :  { %p533_p0 = scmp.ne.s32.totalorder %s31_s19, %s532_s22  ;;  %p538_p2 = scmp.lt.s32.totalorder %s532_s22, %s532_s22 }
   0x7   :  { %p539_p3 = por %p538_p2, %p537_p1 }
   0x9   :  { %p540_p4 = pnand %p539_p3, %p533_p0 }
   0xb   :  { %543 = shalt.err (!%p540_p4)
}
   0xc   :  { %s612_s23 = smov 64   ;;  %s613_s24 = smov 4  }
   0xd   :  { %36 = dma.hbm_to_vmem [thread:$0]  %s667_s1, 1024, %s31_s19, [#allocation7], %s612_s23, %s612_s23, %s613_s24  }
   0xe   :  { %s552_s27 = scalar_lea.vmem %s19_s21, 256  ;;  %p557_p6 = scmp.lt.s32.totalorder %s19_s21, %s19_s21 }
   0xf   :  { %p553_p5 = scmp.ne.s32.totalorder %s19_s21, %s552_s27  ;;  %p558_p7 = scmp.lt.s32.totalorder %s552_s27, %s552_s27 }
  0x11   :  { %p559_p8 = por %p558_p7, %p557_p6 }
  0x13   :  { %p560_p9 = pnand %p559_p8, %p553_p5 }
  0x15   :  { %563 = shalt.err (!%p560_p9)
}
  0x16   :  { %24 = dma.hbm_to_vmem [thread:$0]  %s666_s0, 256, %s19_s21, [#allocation4], %s612_s23, %s612_s23, %s613_s24  }
  0x17   :  { %s614_s30 = smov [#allocation8]  }
  0x18   :  { %s44_s6 = sshll.u32 %s614_s30, 4  ;;  %s45_s6 = int_to_ptr.vmem [resolvable:$true] %s44_s6 }
  0x19   :  { %s572_s7 = scalar_lea.vmem %s45_s6, 1024  ;;  %p577_p11 = scmp.lt.s32.totalorder %s45_s6, %s45_s6 }
  0x1a   :  { %p573_p10 = scmp.ne.s32.totalorder %s45_s6, %s572_s7  ;;  %p578_p12 = scmp.lt.s32.totalorder %s572_s7, %s572_s7 }
  0x1c   :  { %p579_p13 = por %p578_p12, %p577_p11 }
  0x1e   :  { %p580_p0 = pnand %p579_p13, %p573_p10 }
  0x20   :  { %583 = shalt.err (!%p580_p0)
}
  0x21   :  { %50 = dma.hbm_to_vmem [thread:$0]  %s669_s3, 1024, %s45_s6, [#allocation7], %s612_s23, %s612_s23, %s613_s24  }
  0x22   :  { %604 = dma.done.wait [#allocation4], 256  }
  0x23   :  { %605 = vsyncadd [#allocation4], 4294967040 }
  0x24   :  { %606 = dma.done.wait [#allocation7], 2048  }
  0x25   :  { %607 = vsyncadd [#allocation7], 4294965248  ;;  %v498_v0 = vld [vmem:[#allocation6 + $0x38] sm:$0xff]   ;;  %v499_v1 = vld [vmem:[#allocation6 + $0x30] sm:$0xff]   ;;  %s615_s10 = smov [#allocation9]  }
  0x26   :  { %450 = vmatprep.subr.bf16.mxu0 %v498_v0  ;;  %v500_v2 = vld [vmem:[#allocation6 + $0x28] sm:$0xff]   ;;  %v501_v3 = vld [vmem:[#allocation6 + $0x20] sm:$0xff]   ;;  %v506_v4 = vld [vmem:[#allocation3] sm:$0xff]   ;;  %s397_s11 = sshll.u32 %s615_s10, 4  ;;  %s398_s11 = int_to_ptr.vmem [resolvable:$true] %s397_s11 }
  0x27   :  { %451 = vmatpush3.bf16.msra.mxu0 %v498_v0  ;;  %v502_v5 = vld [vmem:[#allocation6 + $0x18] sm:$0xff]   ;;  %466 = vmatprep.mubr.bf16.mxu0 %v506_v4  ;;  %v503_v6 = vld [vmem:[#allocation6 + $0x10] sm:$0xff]   ;;  %v504_v7 = vld [vmem:[#allocation6 + $0x8] sm:$0xff]   ;;  %s584_s12 = scalar_lea.vmem %s398_s11, 512  ;;  %p589_p2 = scmp.lt.s32.totalorder %s398_s11, %s398_s11 }
  0x28   :  { %452 = vmatprep.subr.bf16.mxu0 %v499_v1  ;;  %v505_v8 = vld [vmem:[#allocation6] sm:$0xff]   ;;  %v507_v9 = vld [vmem:[#allocation3 + $0x8] sm:$0xff]   ;;  %v509_v11 = vld [vmem:[#allocation8 + $0x30] sm:$0xff]   ;;  %p585_p1 = scmp.ne.s32.totalorder %s398_s11, %s584_s12  ;;  %p590_p3 = scmp.lt.s32.totalorder %s584_s12, %s584_s12 }
  0x29   :  { %v508_v10 = vld [vmem:[#allocation8 + $0x38] sm:$0xff]   ;;  %v510_v12 = vld [vmem:[#allocation8 + $0x28] sm:$0xff]   ;;  %v511_v13 = vld [vmem:[#allocation8 + $0x20] sm:$0xff]  }
  0x2a   :  { %470 = vmatprep.subr.bf16.mxu1 %v508_v10  ;;  %v512_v14 = vld [vmem:[#allocation8 + $0x18] sm:$0xff]   ;;  %v513_v15 = vld [vmem:[#allocation8 + $0x10] sm:$0xff]   ;;  %v514_v16 = vld [vmem:[#allocation8 + $0x8] sm:$0xff]   ;;  %p591_p4 = por %p590_p3, %p589_p2 }
  0x2b   :  { %453 = vmatpush3.bf16.msra.mxu0 %v499_v1  ;;  %471 = vmatpush3.bf16.msra.mxu1 %v508_v10  ;;  %v515_v17 = vld [vmem:[#allocation8] sm:$0xff]   ;;  %v410_v18 = vld [vmem:[%s668_s2] ss:$0 sm:$0xff] }
  0x2c   :  { %454 = vmatprep.subr.bf16.mxu0 %v500_v2  ;;  %472 = vmatprep.subr.bf16.mxu1 %v509_v11  ;;  %v429_v1 = vld [vmem:[%s670_s4] ss:$0 sm:$0xff]  ;;  %p592_p5 = pnand %p591_p4, %p585_p1 }
  0x2f   :  { %455 = vmatpush3.bf16.msra.mxu0 %v500_v2  ;;  %473 = vmatpush3.bf16.msra.mxu1 %v509_v11 }
  0x30   :  { %456 = vmatprep.subr.bf16.mxu0 %v501_v3  ;;  %474 = vmatprep.subr.bf16.mxu1 %v510_v12 }
  0x33   :  { %457 = vmatpush3.bf16.msra.mxu0 %v501_v3  ;;  %475 = vmatpush3.bf16.msra.mxu1 %v510_v12 }
  0x34   :  { %458 = vmatprep.subr.bf16.mxu0 %v502_v5  ;;  %476 = vmatprep.subr.bf16.mxu1 %v511_v13 }
  0x37   :  { %459 = vmatpush3.bf16.msra.mxu0 %v502_v5  ;;  %477 = vmatpush3.bf16.msra.mxu1 %v511_v13 }
  0x38   :  { %460 = vmatprep.subr.bf16.mxu0 %v503_v6  ;;  %478 = vmatprep.subr.bf16.mxu1 %v512_v14 }
  0x3b   :  { %461 = vmatpush3.bf16.msra.mxu0 %v503_v6  ;;  %479 = vmatpush3.bf16.msra.mxu1 %v512_v14 }
  0x3c   :  { %462 = vmatprep.subr.bf16.mxu0 %v504_v7  ;;  %480 = vmatprep.subr.bf16.mxu1 %v513_v15 }
  0x3f   :  { %463 = vmatpush3.bf16.msra.mxu0 %v504_v7  ;;  %481 = vmatpush3.bf16.msra.mxu1 %v513_v15 }
  0x40   :  { %464 = vmatprep.subr.bf16.mxu0 %v505_v8  ;;  %482 = vmatprep.subr.bf16.mxu1 %v514_v16 }
  0x43   :  { %465 = vmatpush3.bf16.msra.mxu0 %v505_v8  ;;  %483 = vmatpush3.bf16.msra.mxu1 %v514_v16 }
  0x44   :  { %484 = vmatprep.subr.bf16.mxu1 %v515_v17 }
  0x46   :  { %467 = vmatmul.mubr.bf16.vlgmr.msra.gmra.mxu0 %v507_v9 }
  0x47   :  { %485 = vmatpush3.bf16.msra.mxu1 %v515_v17 }
 0x106   :  { %v468_v19 = vpop.f32.mrf.mxu0 }
 0x107   :  { %v201_v20 = vadd.f32 %v468_v19, %v410_v18 }
 0x108   :  { %v192_v21 = vpop.f32.mrf.mxu0 }
 0x109   :  { %v213_v22 = vmul.f32 0.044715, %v201_v20  ;;  %v193_v23 = vadd.f32 %v410_v18, %v192_v21  ;;  %v209_v58 = vmul.f32 0.5, %v201_v20 }
 0x10a   :  { %v469_v24 = vpop.f32.mrf.mxu0 }
 0x10b   :  { %v217_v25 = vmul.f32 %v213_v22, %v201_v20  ;;  %v211_v26 = vmul.f32 0.044715, %v193_v23  ;;  %v204_v27 = vadd.f32 %v469_v24, %v410_v18  ;;  %v207_v55 = vmul.f32 0.5, %v193_v23 }
 0x10c   :  { %v195_v28 = vpop.f32.mrf.mxu0 }
 0x10d   :  { %v221_v29 = vmul.f32 %v217_v25, %v201_v20  ;;  %v214_v30 = vmul.f32 0.044715, %v204_v27  ;;  %v196_v31 = vadd.f32 %v410_v18, %v195_v28  ;;  %v215_v32 = vmul.f32 %v211_v26, %v193_v23 }
 0x10e   :  { %v210_v53 = vmul.f32 0.5, %v204_v27 }
 0x10f   :  { %v218_v33 = vmul.f32 %v214_v30, %v204_v27  ;;  %v212_v34 = vmul.f32 0.044715, %v196_v31  ;;  %v219_v35 = vmul.f32 %v215_v32, %v193_v23  ;;  %v225_v36 = vadd.f32 %v221_v29, %v201_v20 }
 0x110   :  { %v208_v56 = vmul.f32 0.5, %v196_v31 }
 0x111   :  { %v222_v37 = vmul.f32 %v218_v33, %v204_v27  ;;  %v216_v38 = vmul.f32 %v212_v34, %v196_v31  ;;  %v223_v39 = vadd.f32 %v219_v35, %v193_v23  ;;  %v229_v40 = vmul.f32 0.7978846, %v225_v36 }
 0x113   :  { %v220_v41 = vmul.f32 %v216_v38, %v196_v31  ;;  %v227_v42 = vmul.f32 0.7978846, %v223_v39  ;;  %v226_v43 = vadd.f32 %v222_v37, %v204_v27 }
 0x115   :  { %v224_v44 = vadd.f32 %v220_v41, %v196_v31  ;;  %516 = vtanh.f32 %v227_v42  ;;  %v230_v45 = vmul.f32 0.7978846, %v226_v43 }
 0x116   :  { %518 = vtanh.f32 %v229_v40 }
 0x117   :  { %v228_v46 = vmul.f32 0.7978846, %v224_v44  ;;  %520 = vtanh.f32 %v230_v45 }
 0x119   :  { %522 = vtanh.f32 %v228_v46 }
 0x122   :  { %v517_v47 = vpop.eup %516 }
 0x123   :  { %v519_v48 = vpop.eup %518  ;;  %v235_v50 = vadd.f32 1.0, %v517_v47 }
 0x124   :  { %v521_v49 = vpop.eup %520  ;;  %v237_v54 = vadd.f32 1.0, %v519_v48 }
 0x125   :  { %v238_v51 = vadd.f32 1.0, %v521_v49  ;;  %v239_v60 = vmul.f32 %v235_v50, %v207_v55 }
 0x126   :  { %v523_v52 = vpop.eup %522  ;;  %v241_v62 = vmul.f32 %v237_v54, %v209_v58 }
 0x127   :  { %v236_v57 = vadd.f32 1.0, %v523_v52  ;;  %v242_v59 = vmul.f32 %v238_v51, %v210_v53 }
 0x129   :  { %v240_v61 = vmul.f32 %v236_v57, %v208_v56  ;;  %v248_v0 = vpack.c.bf16 %v242_v59, %v241_v62 }
 0x12b   :  { %v247_v63 = vpack.c.bf16 %v240_v61, %v239_v60 }
 0x12d   :  { %486 = vmatprep.mubr.bf16.mxu1 %v247_v63 }
 0x12e   :  { %487 = vmatmul.mubr.bf16.vlgmr.msra.gmra.mxu1 %v248_v0 }
 0x1ee   :  { %v488_v2 = vpop.f32.mrf.mxu1 }
 0x1ef   :  { %v386_v3 = vadd.f32 %v488_v2, %v429_v1 }
 0x1f0   :  { %v347_v4 = vpop.f32.mrf.mxu1 }
 0x1f1   :  { %390 = vst [vmem:[#allocation9 + $0x10] sm:$0xff] %v386_v3  ;;  %v384_v5 = vadd.f32 %v429_v1, %v347_v4 }
 0x1f2   :  { %v489_v6 = vpop.f32.mrf.mxu1 }
 0x1f3   :  { %388 = vst [vmem:[#allocation9] sm:$0xff] %v384_v5  ;;  %v387_v7 = vadd.f32 %v489_v6, %v429_v1 }
 0x1f4   :  { %v350_v8 = vpop.f32.mrf.mxu1 }
 0x1f5   :  { %391 = vst [vmem:[#allocation9 + $0x18] sm:$0xff] %v387_v7  ;;  %v385_v9 = vadd.f32 %v429_v1, %v350_v8 }
 0x1f7   :  { %389 = vst [vmem:[#allocation9 + $0x8] sm:$0xff] %v385_v9 }
 0x1f8   :  { %595 = shalt.err (!%p592_p5)
}
 0x1f9   :  { %s616_s4 = smov 128   ;;  %s617_s13 = smov 8  }
 0x1fa   :  { %403 = dma.vmem_to_hbm [thread:$0]  %s398_s11, 512, %s671_s5, [#allocation5], %s616_s4, %s616_s4, %s617_s13  }
 0x1fb   :  { %608 = dma.done.wait [#allocation5], 512  }
 0x1fc   :  { %609 = vsyncadd [#allocation5], 4294966784 }
 0x1fd   :  { %407 = vsyncpa [#allocation4], 1 }
 0x1fe   :  { %408 = vsyncpa [#allocation7], 1 }
 0x1ff   :  { %409 = vsyncpa [#allocation5], 1 }

</bundles_post_ra>
